<compile_context>
chip_gen: v7x
topology: tpu7x:2x2x1
jax: 0.10.0
libtpu: 0.0.40
codegen_flags: <defaults>
</compile_context>

<pallas_src>
import functools

import numpy as np
import jax
import jax.numpy as jnp
from jax.experimental import pallas as pl
from jax.experimental.pallas import tpu as pltpu

NUM_ROUTING_ITERATIONS = 3


def _vmem_limit_bytes():
    # Use at most half the physical VMEM: 128 MiB (v5e/v6e) -> 64 MiB limit,
    # 64 MiB (v7x) -> 32 MiB limit.  Clamped to [32, 96] MiB.
    cap = 64 * 1024 * 1024
    try:
        cap = int(pltpu.get_tpu_info().vmem_capacity_bytes)
    except Exception:
        pass
    return int(max(32 * 1024 * 1024, min(cap // 2, 96 * 1024 * 1024)))


# ---------------------------------------------------------------------------
# Routing branch (num_route_nodes != -1).
# Layout: activations x (B, R, I) are transposed per call to (I, B, R) so the
# large route-node axis R sits on lanes; route weights are packed once at init
# to (C, I, O, R) bf16.  One grid step per batch tile processes ALL capsules:
# priors (bt, O, R) per capsule are built with an unrolled accumulation over
# the tiny I axis, parked in a VMEM scratch, and the routing iterations run
# lane-dense on (bt, R) logits / (bt, O) outputs.  The kernel writes one
# lane-dense (bt, C*O) slab; the wrapper permutes to torch's (C, B, 1, 1, O).
# ---------------------------------------------------------------------------
def _routing_kernel(xt_ref, wt_ref, out_ref, priors_ref, *, num_iterations):
    # xt_ref:     (I, bt, R)    bf16   activations, route-node axis on lanes
    # wt_ref:     (C, I, O, R)  bf16   route weights (whole tensor, small)
    # out_ref:    (bt, C*O)     f32    lane-dense output slab
    # priors_ref: (C, bt, O, R) f32    VMEM scratch
    I = xt_ref.shape[0]
    C, _, O, R = wt_ref.shape
    inv_r = 1.0 / R

    def squash(s):
        # torch squash (no eps): s * sqrt(|s|^2) / (1 + |s|^2)
        sqn = jnp.sum(s * s, axis=-1, keepdims=True)                  # (bt, 1)
        return s * (sqn * jax.lax.rsqrt(sqn) *
                    pl.reciprocal(1.0 + sqn, approx=True))

    for c in range(C):
        # priors[b, o, r] = sum_i x[b, r, i] * w[c, r, i, o]; f32 accumulation
        # over the tiny I axis (no 4-D broadcast temporary, R stays on lanes).
        pc = (xt_ref[0].astype(jnp.float32)[:, None, :] *
              wt_ref[c, 0].astype(jnp.float32)[None, :, :])           # (bt, O, R)
        for i in range(1, I):
            pc += (xt_ref[i].astype(jnp.float32)[:, None, :] *
                   wt_ref[c, i].astype(jnp.float32)[None, :, :])
        if num_iterations > 1:
            priors_ref[c] = pc                                        # park in VMEM

        # iteration 0: logits == 0  ->  probs == 1/R  (softmax/exp skipped)
        v = squash(jnp.sum(pc, axis=-1) * inv_r)                      # (bt, O)
        if num_iterations > 1:
            # delta_logits is constant along out_channels in the torch ref,
            # so logits are carried as (bt, R).
            logits = jnp.sum(pc * v[:, :, None], axis=1)              # (bt, R)

        for it in range(1, num_iterations):
            p = priors_ref[c]                                         # (bt, O, R)
            m = jnp.max(logits, axis=-1, keepdims=True)
            e = jnp.exp(logits - m)                                   # (bt, R)
            probs = e * pl.reciprocal(jnp.sum(e, axis=-1, keepdims=True),
                                      approx=True)
            v = squash(jnp.sum(p * probs[:, None, :], axis=-1))       # (bt, O)
            if it != num_iterations - 1:
                logits = logits + jnp.sum(p * v[:, :, None], axis=1)  # (bt, R)

        out_ref[:, c * O:(c + 1) * O] = v

    # TODO(synk): for small R (< 128 lanes, e.g. this toy R=32) the route-node
    # lane axis is underfilled; packing O*R onto lanes would recover VPU
    # throughput but needs strided lane reductions.  Production R (multiples of
    # 128, e.g. 1152) is already lane-dense.


def pack_route_weights(route_weights):
    """(C, R, I, O) torch layout -> (C, I, O, R) bf16; call once at init."""
    return jnp.transpose(route_weights, (0, 2, 3, 1)).astype(jnp.bfloat16)


def capsule_routing_forward(x, wt, num_iterations=NUM_ROUTING_ITERATIONS,
                            batch_tile=128):
    # x: (B, R, I) f32; wt: packed route weights (C, I, O, R) bf16.
    # Returns the torch output layout (C, B, 1, 1, O).
    # batch_tile=128 is safe on v7x's 64 MiB VMEM; it can be raised (256-512)
    # on v5e/v6e (128 MiB) for better per-step amortization.
    B, R, I = x.shape
    C, _, O, _ = wt.shape

    xt = jnp.transpose(x, (2, 0, 1)).astype(jnp.bfloat16)             # (I, B, R)
    bt = B if B <= batch_tile else batch_tile
    Bp = pl.cdiv(B, bt) * bt
    if Bp != B:
        xt = jnp.pad(xt, ((0, 0), (0, Bp - B), (0, 0)))
    nb = Bp // bt

    flops = 2 * C * B * R * I * O + num_iterations * 4 * C * B * R * O
    transcendentals = (num_iterations - 1) * C * B * R + 2 * num_iterations * C * B
    # x is now read once (not C times); weights once; output once.
    bytes_accessed = xt.size * 2 + wt.size * 2 + Bp * C * O * 4

    out = pl.pallas_call(
        functools.partial(_routing_kernel, num_iterations=num_iterations),
        out_shape=jax.ShapeDtypeStruct((Bp, C * O), jnp.float32),
        grid=(nb,),
        in_specs=[
            pl.BlockSpec((I, bt, R), lambda b: (0, b, 0)),
            pl.BlockSpec((C, I, O, R), lambda b: (0, 0, 0, 0)),
        ],
        out_specs=pl.BlockSpec((bt, C * O), lambda b: (b, 0)),
        scratch_shapes=[pltpu.VMEM((C, bt, O, R), jnp.float32)],
        compiler_params=pltpu.CompilerParams(
            dimension_semantics=("parallel",),
            vmem_limit_bytes=_vmem_limit_bytes()),
        cost_estimate=pl.CostEstimate(flops=flops,
                                      transcendentals=transcendentals,
                                      bytes_accessed=bytes_accessed),
    )(xt, wt)
    out = out[:B].reshape(B, C, O)
    # TODO(synk): the final (B,C,O) -> (C,B,1,1,O) permute to the torch layout
    # is left to XLA (tiny); the kernel writes one lane-dense (bt, C*O) slab.
    return jnp.transpose(out, (1, 0, 2)).reshape(C, B, 1, 1, O)


# ---------------------------------------------------------------------------
# Conv branch (num_route_nodes == -1): per-capsule Conv2d, concat, squash.
# The wrapper builds im2col patches (B, P, K), K = Cin*k*k (torch OIHW flatten
# order), P = Ho*Wo, flattens (B, P) into one row axis and tiles rows.  Each
# grid step does one fused MXU matmul (tm, K) @ (K, C*Cout) (columns ordered
# c*Cout+cout), adds bias, computes the per-capsule squared norm with a
# lane-dense selector matmul (u*u) @ G (G[k,j]=1 iff k%Cout==j%Cout), squashes,
# and writes a lane-dense (tm, C*Cout) block.  The wrapper then permutes to the
# torch output layout (B, Cout*Ho*Wo, num_capsules).
# ---------------------------------------------------------------------------
def _primary_caps_kernel(rows_ref, w_ref, b_ref, g_ref, out_ref):
    # rows_ref: (tm, K) bf16   w_ref: (K, CC) bf16
    # b_ref: (1, CC) f32       g_ref: (CC, CC) f32   out_ref: (tm, CC) f32
    u = jnp.dot(rows_ref[...], w_ref[...],
                preferred_element_type=jnp.float32) + b_ref[...]      # (tm, CC)
    # squared capsule norm broadcast back per cout, fully lane-dense via MXU
    sqn = jnp.dot(u * u, g_ref[...], preferred_element_type=jnp.float32)
    scale = sqn * jax.lax.rsqrt(sqn) * pl.reciprocal(1.0 + sqn, approx=True)
    out_ref[...] = (u * scale).astype(out_ref.dtype)


def _im2col_nchw(x, k, s):
    # NCHW -> (B, Ho*Wo, Cin*k*k); K ordering matches the OIHW weight flatten.
    # TODO(synk): im2col duplicates input ~k^2x in HBM; building the (tm, K)
    # tile in-kernel from a VMEM-resident x slice would cut HBM traffic
    # (matters most on v5e's lower HBM bandwidth).
    B, Cin, H, W = x.shape
    Ho = (H - k) // s + 1
    Wo = (W - k) // s + 1
    cols = []
    for dy in range(k):
        for dx in range(k):
            patch = x[:, :, dy:dy + s * Ho:s, dx:dx + s * Wo:s]       # (B,Cin,Ho,Wo)
            cols.append(patch.reshape(B, Cin, 1, Ho * Wo))
    cols = jnp.concatenate(cols, axis=2)                    # (B, Cin, k*k, P)
    cols = cols.reshape(B, Cin * k * k, Ho * Wo)            # (B, K, P)
    return jnp.transpose(cols, (0, 2, 1)), Ho, Wo           # (B, P, K)


def pack_conv_params(conv_weights, conv_bias):
    """Fuse per-capsule Conv2d params once at init.

    conv_weights (C, Cout, Cin, k, k), conv_bias (C, Cout) ->
      w_kc (K, C*Cout) bf16, bias (1, C*Cout) f32, G (C*Cout, C*Cout) f32.
    """
    C, Cout, Cin, k, _ = conv_weights.shape
    CC = C * Cout
    K = Cin * k * k
    w_kc = jnp.transpose(conv_weights.reshape(CC, K), (1, 0)).astype(jnp.bfloat16)
    bias = conv_bias.reshape(1, CC).astype(jnp.float32)
    sel = (np.arange(CC)[:, None] % Cout) == (np.arange(CC)[None, :] % Cout)
    g = jnp.asarray(sel, dtype=jnp.float32)
    return w_kc, bias, g


def capsule_conv_forward(x, w_kc, bias, g, *, num_capsules, kernel_size, stride,
                         row_tile=256):
    # x: (B, Cin, H, W) NCHW.  Returns the torch layout (B, Cout*Ho*Wo, C).
    B = x.shape[0]
    K, CC = w_kc.shape
    Cout = CC // num_capsules
    patches, Ho, Wo = _im2col_nchw(x, kernel_size, stride)            # (B, P, K)
    P = Ho * Wo
    M = B * P
    rows = patches.reshape(M, K).astype(jnp.bfloat16)

    if M <= row_tile:
        tm, Mp = M, M
    else:
        tm = row_tile
        Mp = pl.cdiv(M, tm) * tm
        if Mp != M:
            rows = jnp.pad(rows, ((0, Mp - M), (0, 0)))

    flops = 2 * M * K * CC + 2 * M * CC * CC + 4 * M * CC
    bytes_accessed = Mp * K * 2 + K * CC * 2 + CC * 4 + CC * CC * 4 + Mp * CC * 4

    # TODO(synk): for production K = Cin*k*k in the tens of thousands, add a K
    # grid axis marked "arbitrary" with an f32 accumulator scratch so the
    # (K, CC) weight tile stays bounded on v7x's 64 MiB VMEM.
    out = pl.pallas_call(
        _primary_caps_kernel,
        out_shape=jax.ShapeDtypeStruct((Mp, CC), jnp.float32),
        grid=(Mp // tm,),
        in_specs=[
            pl.BlockSpec((tm, K), lambda r: (r, 0)),
            pl.BlockSpec((K, CC), lambda r: (0, 0)),
            pl.BlockSpec((1, CC), lambda r: (0, 0)),
            pl.BlockSpec((CC, CC), lambda r: (0, 0)),
        ],
        out_specs=pl.BlockSpec((tm, CC), lambda r: (r, 0)),
        compiler_params=pltpu.CompilerParams(
            dimension_semantics=("parallel",),
            vmem_limit_bytes=_vmem_limit_bytes()),
        cost_estimate=pl.CostEstimate(flops=flops,
                                      transcendentals=2 * M * CC,
                                      bytes_accessed=bytes_accessed),
    )(rows, w_kc, bias, g)

    out = out[:M].reshape(B, P, num_capsules, Cout)
    # (B, P, C, Cout) -> torch layout (B, Cout*Ho*Wo, num_capsules); the final
    # permute is left to XLA (writing it from the kernel would require
    # lane-sparse C-wide stores since the tiny capsule axis is last).
    return jnp.transpose(out, (0, 3, 1, 2)).reshape(B, Cout * P, num_capsules)


# ---------------------------------------------------------------------------
# Pure-JAX references (numerics check only).
# ---------------------------------------------------------------------------
def _routing_reference(x, w, num_iterations):
    priors = jnp.einsum('bri,crio->cbro', x, w,
                        precision=jax.lax.Precision.HIGHEST)[:, :, :, None, :]
    logits = jnp.zeros_like(priors)
    outputs = None
    for i in range(num_iterations):
        probs = jax.nn.softmax(logits, axis=2)
        s = jnp.sum(probs * priors, axis=2, keepdims=True)
        sqn = jnp.sum(s * s, axis=-1, keepdims=True)
        outputs = sqn / (1.0 + sqn) * s / jnp.sqrt(sqn)
        if i != num_iterations - 1:
            logits = logits + jnp.sum(priors * outputs, axis=-1, keepdims=True)
    return outputs


def _primary_reference(x, w, b, stride):
    B = x.shape[0]
    outs = []
    for c in range(w.shape[0]):
        y = jax.lax.conv_general_dilated(
            x, w[c], (stride, stride), 'VALID',
            dimension_numbers=('NCHW', 'OIHW', 'NCHW'),
            precision=jax.lax.Precision.HIGHEST)
        y = y + b[c][None, :, None, None]
        outs.append(y.reshape(B, -1, 1))
    u = jnp.concatenate(outs, axis=-1)
    sqn = jnp.sum(u * u, axis=-1, keepdims=True)
    return sqn / (1.0 + sqn) * u / jnp.sqrt(sqn)


if __name__ == "__main__":
    key = jax.random.PRNGKey(0)
    k1, k2, k3, k4, k5 = jax.random.split(key, 5)

    # --- conv (primary-capsule) branch: num_route_nodes == -1 ---
    B, Cin, H, W = 2, 4, 16, 16
    Cprim, Cout, ksz, stride = 4, 8, 3, 2
    x_img = jax.random.normal(k1, (B, Cin, H, W), jnp.float32)
    conv_w = jax.random.normal(k2, (Cprim, Cout, Cin, ksz, ksz), jnp.float32) * 0.1
    conv_b = jax.random.normal(k3, (Cprim, Cout), jnp.float32) * 0.1
    w_kc, b_cc, g_sel = pack_conv_params(conv_w, conv_b)   # one-time packing
    prim_out = capsule_conv_forward(x_img, w_kc, b_cc, g_sel,
                                    num_capsules=Cprim, kernel_size=ksz,
                                    stride=stride)
    jax.block_until_ready(prim_out)

    # --- routing (digit-capsule) branch: num_route_nodes != -1 ---
    # binary classification -> 2 output capsules
    Ccaps, R, I, O = 2, 32, 8, 16
    x_caps = jax.random.normal(k4, (B, R, I), jnp.float32)
    route_w = jax.random.normal(k5, (Ccaps, R, I, O), jnp.float32)
    wt = pack_route_weights(route_w)                       # one-time packing
    dig_out = capsule_routing_forward(x_caps, wt,
                                      num_iterations=NUM_ROUTING_ITERATIONS)
    jax.block_until_ready(dig_out)

    # numerics / shape checks against pure-JAX references fed the same
    # bf16-rounded inputs the kernels consume (kernel math accumulates in f32).
    r32 = lambda a: a.astype(jnp.bfloat16).astype(jnp.float32)
    ref_prim = _primary_reference(r32(x_img), r32(conv_w), conv_b, stride)
    ref_dig = _routing_reference(r32(x_caps), r32(route_w),
                                 NUM_ROUTING_ITERATIONS)
    Ho = (H - ksz) // stride + 1
    assert prim_out.shape == ref_prim.shape == (B, Cout * Ho * Ho, Cprim)
    assert dig_out.shape == ref_dig.shape == (Ccaps, B, 1, 1, O)
    np.testing.assert_allclose(np.asarray(prim_out), np.asarray(ref_prim),
                               rtol=1e-2, atol=1e-2)
    np.testing.assert_allclose(np.asarray(dig_out), np.asarray(ref_dig),
                               rtol=1e-2, atol=1e-2)
    print("KERNEL_OK")
</pallas_src>

<mosaic_0001>
module attributes {stable_mosaic.version = 11 : i64} {
  func.func @_primary_caps_kernel(%arg0: i32, %arg1: memref<98x36xbf16, #tpu.memory_space<vmem>>, %arg2: memref<36x32xbf16, #tpu.memory_space<vmem>>, %arg3: memref<1x32xf32, #tpu.memory_space<vmem>>, %arg4: memref<32x32xf32, #tpu.memory_space<vmem>>, %arg5: memref<98x32xf32, #tpu.memory_space<vmem>>) attributes {dimension_semantics = [#tpu.dimension_semantics<parallel>], iteration_bounds = array<i64: 1>, scalar_prefetch = 0 : i64, scratch_operands = 0 : i64, tpu.core_type = #tpu.core_type<tc>, window_params = [{transform_indices = @transform_0, window_bounds = array<i64: 98, 36>}, {pipeline_mode = #tpu.pipeline_mode<synchronous>, transform_indices = @transform_1, window_bounds = array<i64: 36, 32>}, {pipeline_mode = #tpu.pipeline_mode<synchronous>, transform_indices = @transform_2, window_bounds = array<i64: 1, 32>}, {pipeline_mode = #tpu.pipeline_mode<synchronous>, transform_indices = @transform_3, window_bounds = array<i64: 32, 32>}, {transform_indices = @transform_4, window_bounds = array<i64: 98, 32>}]} {
    %c0 = arith.constant 0 : index
    %c0_0 = arith.constant 0 : index
    %0 = vector.load %arg1[%c0, %c0_0] : memref<98x36xbf16, #tpu.memory_space<vmem>>, vector<98x36xbf16>
    %c0_1 = arith.constant 0 : index
    %c0_2 = arith.constant 0 : index
    %1 = vector.load %arg2[%c0_1, %c0_2] : memref<36x32xbf16, #tpu.memory_space<vmem>>, vector<36x32xbf16>
    %cst = arith.constant dense<0.000000e+00> : vector<98x32xf32>
    %2 = tpu.matmul %0, %1, %cst {dimension_numbers = #tpu.dot_dimension_numbers<[1], [0], [0], [1], [0, 0, 1, 1], [], []>} : vector<98x36xbf16>, vector<36x32xbf16>, vector<98x32xf32> -> vector<98x32xf32>
    %c0_3 = arith.constant 0 : index
    %c0_4 = arith.constant 0 : index
    %3 = vector.load %arg3[%c0_3, %c0_4] : memref<1x32xf32, #tpu.memory_space<vmem>>, vector<1x32xf32>
    %4 = vector.broadcast %3 : vector<1x32xf32> to vector<98x32xf32>
    %5 = arith.addf %2, %4 : vector<98x32xf32>
    %6 = arith.mulf %5, %5 : vector<98x32xf32>
    %c0_5 = arith.constant 0 : index
    %c0_6 = arith.constant 0 : index
    %7 = vector.load %arg4[%c0_5, %c0_6] : memref<32x32xf32, #tpu.memory_space<vmem>>, vector<32x32xf32>
    %cst_7 = arith.constant dense<0.000000e+00> : vector<98x32xf32>
    %8 = tpu.matmul %6, %7, %cst_7 {dimension_numbers = #tpu.dot_dimension_numbers<[1], [0], [0], [1], [0, 0, 1, 1], [], []>} : vector<98x32xf32>, vector<32x32xf32>, vector<98x32xf32> -> vector<98x32xf32>
    %9 = math.rsqrt %8 : vector<98x32xf32>
    %10 = arith.mulf %8, %9 : vector<98x32xf32>
    %cst_8 = arith.constant 1.000000e+00 : f32
    %11 = vector.broadcast %cst_8 : f32 to vector<98x32xf32>
    %12 = arith.addf %11, %8 : vector<98x32xf32>
    %13 = tpu.reciprocal %12 {approx = true} : vector<98x32xf32> -> vector<98x32xf32>
    %14 = arith.mulf %10, %13 : vector<98x32xf32>
    %15 = arith.mulf %5, %14 : vector<98x32xf32>
    %c0_9 = arith.constant 0 : index
    %c0_10 = arith.constant 0 : index
    %16 = vector.load %arg5[%c0_9, %c0_10] : memref<98x32xf32, #tpu.memory_space<vmem>>, vector<98x32xf32>
    tpu.vector_store %arg5[%c0_9, %c0_10], %15 {strides = array<i32>} : memref<98x32xf32, #tpu.memory_space<vmem>>, vector<98x32xf32>,
    return
  }
  func.func @transform_0(%arg0: i32) -> (i32, i32) {
    %c0_i32 = arith.constant 0 : i32
    %c0_i32_0 = arith.constant 0 : i32
    return %arg0, %c0_i32 : i32, i32
  }
  func.func @transform_1(%arg0: i32) -> (i32, i32) {
    %c0_i32 = arith.constant 0 : i32
    %c0_i32_0 = arith.constant 0 : i32
    %c0_i32_1 = arith.constant 0 : i32
    return %c0_i32, %c0_i32_0 : i32, i32
  }
  func.func @transform_2(%arg0: i32) -> (i32, i32) {
    %c0_i32 = arith.constant 0 : i32
    %c0_i32_0 = arith.constant 0 : i32
    %c0_i32_1 = arith.constant 0 : i32
    return %c0_i32, %c0_i32_0 : i32, i32
  }
  func.func @transform_3(%arg0: i32) -> (i32, i32) {
    %c0_i32 = arith.constant 0 : i32
    %c0_i32_0 = arith.constant 0 : i32
    %c0_i32_1 = arith.constant 0 : i32
    return %c0_i32, %c0_i32_0 : i32, i32
  }
  func.func @transform_4(%arg0: i32) -> (i32, i32) {
    %c0_i32 = arith.constant 0 : i32
    %c0_i32_0 = arith.constant 0 : i32
    return %arg0, %c0_i32 : i32, i32
  }
}

</mosaic_0001>

<bundles_post_ra>
// kernel: tpu_custom_call.1
= control target key start
LH: loop header
LB: loop body
LE: loop exit
PB: predicated region body
PF: predicated region fallthrough
CT: control target
= control target key end

     0   :  { %v698_v0 = vmov 0.0   ;;  %vm699_vm0 = vmmov 0   ;;  %v700_v2 = vmov 0.0|0.0   ;;  %vm113_vm1 = vcmask 1041408   ;;  %s965_s1 = inlined_call_operand.vmem [shape: bf16[36,32], index: 1, kind: input, shape index: {}]   ;;  %s966_s0 = inlined_call_operand.vmem [shape: bf16[98,36], index: 0, kind: input, shape index: {}]   ;;  %s967_s3 = inlined_call_operand.vmem [shape: f32[32,32], index: 3, kind: input, shape index: {}]   ;;  %s968_s2 = inlined_call_operand.vmem [shape: f32[1,32], index: 2, kind: input, shape index: {}]   ;;  %s969_s4 = inlined_call_operand.vmem [shape: f32[98,32], index: 4, kind: output, shape index: {}]  }
   0x1   :  { %546 = vmatprep.subr.bf16.mxu0 %v698_v0  ;;  %v636_v1 = vld [vmem:[%s965_s1] sm:$0xff]   ;;  %552 = vmatprep.mubr.msk.bf16.mxu0 %vm699_vm0, %v698_v0  ;;  %v637_v3 = vld [vmem:[%s965_s1 + $0x8] sm:$0xff]   ;;  %v638_v4 = vld [vmem:[%s965_s1 + $0x10] ss:$0 sps:$4 sm:$0x33]   ;;  %vm91_vm2 = vcmask 293888  }
   0x2   :  { %627 = vmatprep.subr.bf16.mxu1 %v700_v2  ;;  %588 = vmatprep.mubr.msk.f32.mxu1 %vm699_vm0, %v698_v0  ;;  %v115_v5 = vsel %vm113_vm1, %v638_v4, 0  ;;  %v639_v6 = vld [vmem:[%s966_s0] sm:$0xff]   ;;  %v219_v8 = vld [vmem:[%s967_s3 + $0x8] sm:$0xff]  ;;  %v641_v11 = vld [vmem:[%s966_s0 + $0x10] sm:$0xff]   ;;  %vm222_vm3 = vcmask 261120   ;;  %vm482_vm4 = vcmask 254976  }
   0x3   :  { %547 = vmatpush3.bf16.msra.mxu0 %v636_v1  ;;  %v218_v7 = vld [vmem:[%s967_s3] sm:$0xff]  ;;  %v640_v10 = vld [vmem:[%s966_s0 + $0x8] sm:$0xff]   ;;  %v642_v12 = vld [vmem:[%s966_s0 + $0x18] sm:$0xff]  }
   0x4   :  { %548 = vmatprep.subr.bf16.mxu0 %v698_v0  ;;  %v628_v9 = vpack.c.bf16 %v219_v8, %v218_v7  ;;  %v643_v13 = vld [vmem:[%s966_s0 + $0x20] sm:$0xff]   ;;  %v644_v14 = vld [vmem:[%s966_s0 + $0x28] sm:$0xff]   ;;  %v645_v15 = vld [vmem:[%s966_s0 + $0x30] ss:$0 sps:$4 sm:$0x11]  }
   0x5   :  { %v220_v16 = vld [vmem:[%s967_s3 + $0x10] sm:$0xff]  ;;  %v221_v17 = vld [vmem:[%s967_s3 + $0x18] sm:$0xff]  ;;  %v797_v19 = vld [vmem:[%s968_s2] ss:$0 sm:$0xff] }
   0x6   :  { %629 = vmatpush3.bf16.msra.mxu1 %v628_v9  ;;  %v631_v18 = vpack.c.bf16 %v221_v17, %v220_v16 }
   0x7   :  { %549 = vmatpush3.bf16.msra.mxu0 %v637_v3  ;;  %630 = vmatprep.subr.bf16.mxu1 %v700_v2 }
   0x8   :  { %550 = vmatprep.subr.bf16.mxu0 %v698_v0 }
   0xa   :  { %632 = vmatpush3.bf16.msra.mxu1 %v631_v18 }
   0xb   :  { %551 = vmatpush3.bf16.msra.mxu0 %v115_v5 }
   0xe   :  { %553 = vmatmul.mubr.msk.bf16.vlgmr.msra.gmra.mrb[0].mxu0 %vm91_vm2, %v639_v6 }
   0xf   :  { %556 = vmatprep.mubr.msk.bf16.mxu0 %vm699_vm0, %v698_v0 }
  0x16   :  { %557 = vmatmul.mubr.msk.bf16.gmra.mrb[4].mxu0 %vm91_vm2, %v640_v10 }
  0x17   :  { %560 = vmatprep.mubr.msk.bf16.mxu0 %vm699_vm0, %v698_v0 }
  0x1e   :  { %561 = vmatmul.mubr.msk.bf16.gmra.mrb[8].mxu0 %vm91_vm2, %v641_v11 }
  0x1f   :  { %564 = vmatprep.mubr.msk.bf16.mxu0 %vm699_vm0, %v698_v0 }
  0x26   :  { %565 = vmatmul.mubr.msk.bf16.gmra.mrb[12].mxu0 %vm91_vm2, %v642_v12 }
  0x27   :  { %568 = vmatprep.mubr.msk.bf16.mxu0 %vm699_vm0, %v698_v0 }
  0x2e   :  { %569 = vmatmul.mubr.msk.bf16.gmra.mrb[16].mxu0 %vm91_vm2, %v643_v13 }
  0x2f   :  { %572 = vmatprep.mubr.msk.bf16.mxu0 %vm699_vm0, %v698_v0 }
  0x36   :  { %573 = vmatmul.mubr.msk.bf16.gmra.mrb[20].mxu0 %vm91_vm2, %v644_v14 }
  0x37   :  { %576 = vmatprep.mubr.msk.bf16.mxu0 %vm699_vm0, %v698_v0 }
  0x3e   :  { %577 = vmatmul.mubr.msk.bf16.gmra.mrb[24].mxu0 %vm91_vm2, %v645_v15 }
  0xe1   :  { %v151_v20 = vpop.f32.mrb[0].mxu0 }
  0xe2   :  { %v800_v21 = vadd.f32 %v797_v19, %v151_v20  ;;  %v554_v22 = vpop.f32.mrb[1].mxu0 }
  0xe3   :  { %v154_v23 = vpop.f32.mrb[2].mxu0 }
  0xe4   :  { %v205_v24 = vmul.f32 %v800_v21, %v800_v21  ;;  %v805_v25 = vadd.f32 %v797_v19, %v154_v23  ;;  %v555_v26 = vpop.f32.mrb[3].mxu0 }
  0xe6   :  { %589 = vmatmul.mubr.msk.f32.vlgmr.msra.gmra.mrb[0].mxu1 %vm222_vm3, %v205_v24  ;;  %v206_v27 = vmul.f32 %v805_v25, %v805_v25 }
  0xe7   :  { %591 = vmatprep.mubr.msk.f32.mxu1 %vm699_vm0, %v698_v0 }
  0xe9   :  { %v159_v28 = vpop.f32.mrb[4].mxu0 }
  0xea   :  { %v813_v29 = vadd.f32 %v797_v19, %v159_v28  ;;  %v558_v30 = vpop.f32.mrb[5].mxu0  ;;  %592 = vmatmul.mubr.msk.f32.gmra.mrb[2].mxu1 %vm222_vm3, %v206_v27 }
  0xeb   :  { %v162_v31 = vpop.f32.mrb[6].mxu0  ;;  %594 = vmatprep.mubr.msk.f32.mxu1 %vm699_vm0, %v698_v0 }
  0xec   :  { %v207_v32 = vmul.f32 %v813_v29, %v813_v29  ;;  %v821_v33 = vadd.f32 %v797_v19, %v162_v31  ;;  %v559_v34 = vpop.f32.mrb[7].mxu0 }
  0xee   :  { %595 = vmatmul.mubr.msk.f32.gmra.mrb[4].mxu1 %vm222_vm3, %v207_v32  ;;  %v208_v35 = vmul.f32 %v821_v33, %v821_v33 }
  0xef   :  { %597 = vmatprep.mubr.msk.f32.mxu1 %vm699_vm0, %v698_v0 }
  0xf1   :  { %v167_v36 = vpop.f32.mrb[8].mxu0 }
  0xf2   :  { %v829_v37 = vadd.f32 %v797_v19, %v167_v36  ;;  %v562_v38 = vpop.f32.mrb[9].mxu0  ;;  %598 = vmatmul.mubr.msk.f32.gmra.mrb[6].mxu1 %vm222_vm3, %v208_v35 }
  0xf3   :  { %v170_v39 = vpop.f32.mrb[10].mxu0  ;;  %600 = vmatprep.mubr.msk.f32.mxu1 %vm699_vm0, %v698_v0 }
  0xf4   :  { %v209_v40 = vmul.f32 %v829_v37, %v829_v37  ;;  %v837_v41 = vadd.f32 %v797_v19, %v170_v39  ;;  %v563_v42 = vpop.f32.mrb[11].mxu0 }
  0xf6   :  { %601 = vmatmul.mubr.msk.f32.gmra.mrb[8].mxu1 %vm222_vm3, %v209_v40  ;;  %v210_v43 = vmul.f32 %v837_v41, %v837_v41 }
  0xf7   :  { %603 = vmatprep.mubr.msk.f32.mxu1 %vm699_vm0, %v698_v0 }
  0xf9   :  { %v175_v44 = vpop.f32.mrb[12].mxu0 }
  0xfa   :  { %v845_v45 = vadd.f32 %v797_v19, %v175_v44  ;;  %v566_v46 = vpop.f32.mrb[13].mxu0  ;;  %604 = vmatmul.mubr.msk.f32.gmra.mrb[10].mxu1 %vm222_vm3, %v210_v43 }
  0xfb   :  { %v178_v47 = vpop.f32.mrb[14].mxu0  ;;  %606 = vmatprep.mubr.msk.f32.mxu1 %vm699_vm0, %v698_v0 }
  0xfc   :  { %v211_v48 = vmul.f32 %v845_v45, %v845_v45  ;;  %v853_v49 = vadd.f32 %v797_v19, %v178_v47  ;;  %v567_v50 = vpop.f32.mrb[15].mxu0 }
  0xfe   :  { %607 = vmatmul.mubr.msk.f32.gmra.mrb[12].mxu1 %vm222_vm3, %v211_v48  ;;  %v212_v51 = vmul.f32 %v853_v49, %v853_v49 }
  0xff   :  { %609 = vmatprep.mubr.msk.f32.mxu1 %vm699_vm0, %v698_v0 }
 0x101   :  { %v183_v52 = vpop.f32.mrb[16].mxu0 }
 0x102   :  { %v861_v53 = vadd.f32 %v797_v19, %v183_v52  ;;  %v570_v54 = vpop.f32.mrb[17].mxu0  ;;  %610 = vmatmul.mubr.msk.f32.gmra.mrb[14].mxu1 %vm222_vm3, %v212_v51 }
 0x103   :  { %v186_v55 = vpop.f32.mrb[18].mxu0  ;;  %612 = vmatprep.mubr.msk.f32.mxu1 %vm699_vm0, %v698_v0 }
 0x104   :  { %v213_v56 = vmul.f32 %v861_v53, %v861_v53  ;;  %v869_v57 = vadd.f32 %v797_v19, %v186_v55  ;;  %v571_v58 = vpop.f32.mrb[19].mxu0 }
 0x106   :  { %613 = vmatmul.mubr.msk.f32.gmra.mrb[16].mxu1 %vm222_vm3, %v213_v56  ;;  %v214_v59 = vmul.f32 %v869_v57, %v869_v57 }
 0x107   :  { %615 = vmatprep.mubr.msk.f32.mxu1 %vm699_vm0, %v698_v0 }
 0x109   :  { %v191_v60 = vpop.f32.mrb[20].mxu0 }
 0x10a   :  { %v877_v61 = vadd.f32 %v797_v19, %v191_v60  ;;  %v574_v62 = vpop.f32.mrb[21].mxu0  ;;  %616 = vmatmul.mubr.msk.f32.gmra.mrb[18].mxu1 %vm222_vm3, %v214_v59 }
 0x10b   :  { %v194_v63 = vpop.f32.mrb[22].mxu0  ;;  %618 = vmatprep.mubr.msk.f32.mxu1 %vm699_vm0, %v698_v0 }
 0x10c   :  { %v215_v1 = vmul.f32 %v877_v61, %v877_v61  ;;  %v885_v2 = vadd.f32 %v797_v19, %v194_v63  ;;  %v575_v3 = vpop.f32.mrb[23].mxu0 }
 0x10e   :  { %619 = vmatmul.mubr.msk.f32.gmra.mrb[20].mxu1 %vm222_vm3, %v215_v1  ;;  %v216_v4 = vmul.f32 %v885_v2, %v885_v2 }
 0x10f   :  { %621 = vmatprep.mubr.msk.f32.mxu1 %vm699_vm0, %v698_v0 }
 0x111   :  { %v199_v5 = vpop.f32.mrb[24].mxu0 }
 0x112   :  { %v893_v6 = vadd.f32 %v797_v19, %v199_v5  ;;  %v578_v7 = vpop.f32.mrb[25].mxu0  ;;  %622 = vmatmul.mubr.msk.f32.gmra.mrb[22].mxu1 %vm222_vm3, %v216_v4 }
 0x113   :  { %v202_v8 = vpop.f32.mrb[26].mxu0  ;;  %624 = vmatprep.mubr.msk.f32.mxu1 %vm699_vm0, %v698_v0 }
 0x114   :  { %v217_v9 = vmul.f32 %v893_v6, %v893_v6  ;;  %v579_v10 = vpop.f32.mrb[27].mxu0 }
 0x116   :  { %625 = vmatmul.mubr.msk.f32.gmra.mrb[24].mxu1 %vm222_vm3, %v217_v9 }
 0x1b9   :  { %v328_v11 = vpop.f32.mrb[0].mxu1 }
 0x1ba   :  { %646 = vrsqrt.f32 %v328_v11  ;;  %v418_v12 = vadd.f32 1.0, %v328_v11  ;;  %v590_v13 = vpop.f32.mrb[1].mxu1 }
 0x1bc   :  { %648 = vrcp.f32 %v418_v12 }
 0x1bd   :  { %v333_v14 = vpop.f32.mrb[2].mxu1 }
 0x1be   :  { %650 = vrsqrt.f32 %v333_v14  ;;  %v419_v15 = vadd.f32 1.0, %v333_v14  ;;  %v593_v16 = vpop.f32.mrb[3].mxu1 }
 0x1c0   :  { %652 = vrcp.f32 %v419_v15 }
 0x1c1   :  { %v338_v17 = vpop.f32.mrb[4].mxu1 }
 0x1c2   :  { %654 = vrsqrt.f32 %v338_v17  ;;  %v420_v18 = vadd.f32 1.0, %v338_v17  ;;  %v596_v0 = vpop.f32.mrb[5].mxu1 }
 0x1c4   :  { %v647_v19 = vpop.eup %646  ;;  %656 = vrcp.f32 %v420_v18 }
 0x1c5   :  { %v405_v20 = vmul.f32 %v647_v19, %v328_v11  ;;  %v343_v22 = vpop.f32.mrb[6].mxu1 }
 0x1c6   :  { %v649_v23 = vpop.eup %648  ;;  %658 = vrsqrt.f32 %v343_v22  ;;  %v421_v24 = vadd.f32 1.0, %v343_v22  ;;  %v599_v26 = vpop.f32.mrb[7].mxu1 }
 0x1c7   :  { %v444_v27 = vmul.f32 %v649_v23, %v405_v20 }
 0x1c8   :  { %v651_v28 = vpop.eup %650  ;;  %660 = vrcp.f32 %v421_v24 }
 0x1c9   :  { %v457_v30 = vmul.f32 %v444_v27, %v800_v21  ;;  %v406_v31 = vmul.f32 %v651_v28, %v333_v14  ;;  %v348_v32 = vpop.f32.mrb[8].mxu1 }
 0x1ca   :  { %v653_v34 = vpop.eup %652  ;;  %662 = vrsqrt.f32 %v348_v32  ;;  %v422_v35 = vadd.f32 1.0, %v348_v32  ;;  %v602_v36 = vpop.f32.mrb[9].mxu1 }
 0x1cb   :  { %470 = vst.msk [vmem:[%s969_s4] sm:$0xff] %vm222_vm3, %v457_v30  ;;  %v445_v38 = vmul.f32 %v653_v34, %v406_v31 }
 0x1cc   :  { %v655_v39 = vpop.eup %654  ;;  %664 = vrcp.f32 %v422_v35 }
 0x1cd   :  { %v458_v40 = vmul.f32 %v445_v38, %v805_v25  ;;  %v407_v42 = vmul.f32 %v655_v39, %v338_v17  ;;  %v353_v43 = vpop.f32.mrb[10].mxu1 }
 0x1ce   :  { %v657_v44 = vpop.eup %656  ;;  %666 = vrsqrt.f32 %v353_v43  ;;  %v423_v21 = vadd.f32 1.0, %v353_v43  ;;  %v605_v46 = vpop.f32.mrb[11].mxu1 }
 0x1cf   :  { %471 = vst.msk [vmem:[%s969_s4 + $0x8] sm:$0xff] %vm222_vm3, %v458_v40  ;;  %v446_v47 = vmul.f32 %v657_v44, %v407_v42 }
 0x1d0   :  { %v659_v48 = vpop.eup %658  ;;  %668 = vrcp.f32 %v423_v21 }
 0x1d1   :  { %v459_v50 = vmul.f32 %v446_v47, %v813_v29  ;;  %v408_v51 = vmul.f32 %v659_v48, %v343_v22  ;;  %v358_v52 = vpop.f32.mrb[12].mxu1 }
 0x1d2   :  { %v661_v54 = vpop.eup %660  ;;  %670 = vrsqrt.f32 %v358_v52  ;;  %v424_v25 = vadd.f32 1.0, %v358_v52  ;;  %v608_v55 = vpop.f32.mrb[13].mxu1 }
 0x1d3   :  { %472 = vst.msk [vmem:[%s969_s4 + $0x10] sm:$0xff] %vm222_vm3, %v459_v50  ;;  %v447_v56 = vmul.f32 %v661_v54, %v408_v51 }
 0x1d4   :  { %v663_v58 = vpop.eup %662  ;;  %672 = vrcp.f32 %v424_v25 }
 0x1d5   :  { %v460_v59 = vmul.f32 %v447_v56, %v821_v33  ;;  %v409_v60 = vmul.f32 %v663_v58, %v348_v32  ;;  %v363_v62 = vpop.f32.mrb[14].mxu1 }
 0x1d6   :  { %v665_v63 = vpop.eup %664  ;;  %674 = vrsqrt.f32 %v363_v62  ;;  %v425_v29 = vadd.f32 1.0, %v363_v62  ;;  %v611_v1 = vpop.f32.mrb[15].mxu1 }
 0x1d7   :  { %473 = vst.msk [vmem:[%s969_s4 + $0x18] sm:$0xff] %vm222_vm3, %v460_v59  ;;  %v448_v3 = vmul.f32 %v665_v63, %v409_v60 }
 0x1d8   :  { %v667_v4 = vpop.eup %666  ;;  %676 = vrcp.f32 %v425_v29 }
 0x1d9   :  { %v461_v5 = vmul.f32 %v448_v3, %v829_v37  ;;  %v410_v7 = vmul.f32 %v667_v4, %v353_v43  ;;  %v368_v8 = vpop.f32.mrb[16].mxu1 }
 0x1da   :  { %v669_v9 = vpop.eup %668  ;;  %678 = vrsqrt.f32 %v368_v8  ;;  %v426_v33 = vadd.f32 1.0, %v368_v8  ;;  %v614_v10 = vpop.f32.mrb[17].mxu1 }
 0x1db   :  { %474 = vst.msk [vmem:[%s969_s4 + $0x20] sm:$0xff] %vm222_vm3, %v461_v5  ;;  %v449_v11 = vmul.f32 %v669_v9, %v410_v7 }
 0x1dc   :  { %v671_v12 = vpop.eup %670  ;;  %680 = vrcp.f32 %v426_v33 }
 0x1dd   :  { %v462_v13 = vmul.f32 %v449_v11, %v837_v41  ;;  %v411_v14 = vmul.f32 %v671_v12, %v358_v52  ;;  %v373_v15 = vpop.f32.mrb[18].mxu1 }
 0x1de   :  { %v673_v16 = vpop.eup %672  ;;  %682 = vrsqrt.f32 %v373_v15  ;;  %v427_v37 = vadd.f32 1.0, %v373_v15  ;;  %v617_v17 = vpop.f32.mrb[19].mxu1 }
 0x1df   :  { %475 = vst.msk [vmem:[%s969_s4 + $0x28] sm:$0xff] %vm222_vm3, %v462_v13  ;;  %v450_v18 = vmul.f32 %v673_v16, %v411_v14 }
 0x1e0   :  { %v675_v0 = vpop.eup %674  ;;  %684 = vrcp.f32 %v427_v37 }
 0x1e1   :  { %v463_v19 = vmul.f32 %v450_v18, %v845_v45  ;;  %v412_v20 = vmul.f32 %v675_v0, %v363_v62  ;;  %v378_v22 = vpop.f32.mrb[20].mxu1 }
 0x1e2   :  { %v677_v23 = vpop.eup %676  ;;  %686 = vrsqrt.f32 %v378_v22  ;;  %v428_v41 = vadd.f32 1.0, %v378_v22  ;;  %v620_v24 = vpop.f32.mrb[21].mxu1 }
 0x1e3   :  { %476 = vst.msk [vmem:[%s969_s4 + $0x30] sm:$0xff] %vm222_vm3, %v463_v19  ;;  %v451_v26 = vmul.f32 %v677_v23, %v412_v20 }
 0x1e4   :  { %v679_v27 = vpop.eup %678  ;;  %688 = vrcp.f32 %v428_v41 }
 0x1e5   :  { %v464_v28 = vmul.f32 %v451_v26, %v853_v49  ;;  %v413_v30 = vmul.f32 %v679_v27, %v368_v8  ;;  %v383_v31 = vpop.f32.mrb[22].mxu1 }
 0x1e6   :  { %v681_v32 = vpop.eup %680  ;;  %690 = vrsqrt.f32 %v383_v31  ;;  %v429_v45 = vadd.f32 1.0, %v383_v31  ;;  %v623_v34 = vpop.f32.mrb[23].mxu1 }
 0x1e7   :  { %477 = vst.msk [vmem:[%s969_s4 + $0x38] sm:$0xff] %vm222_vm3, %v464_v28  ;;  %v452_v35 = vmul.f32 %v681_v32, %v413_v30 }
 0x1e8   :  { %v683_v36 = vpop.eup %682  ;;  %692 = vrcp.f32 %v429_v45 }
 0x1e9   :  { %v465_v38 = vmul.f32 %v452_v35, %v861_v53  ;;  %v414_v39 = vmul.f32 %v683_v36, %v373_v15  ;;  %v388_v40 = vpop.f32.mrb[24].mxu1 }
 0x1ea   :  { %v685_v42 = vpop.eup %684  ;;  %694 = vrsqrt.f32 %v388_v40  ;;  %v430_v49 = vadd.f32 1.0, %v388_v40  ;;  %v626_v43 = vpop.f32.mrb[25].mxu1 }
 0x1eb   :  { %478 = vst.msk [vmem:[%s969_s4 + $0x40] sm:$0xff] %vm222_vm3, %v465_v38  ;;  %v453_v44 = vmul.f32 %v685_v42, %v414_v39 }
 0x1ec   :  { %v687_v21 = vpop.eup %686  ;;  %696 = vrcp.f32 %v430_v49 }
 0x1ed   :  { %v466_v46 = vmul.f32 %v453_v44, %v869_v57  ;;  %v415_v47 = vmul.f32 %v687_v21, %v378_v22 }
 0x1ee   :  { %v689_v48 = vpop.eup %688 }
 0x1ef   :  { %479 = vst.msk [vmem:[%s969_s4 + $0x48] sm:$0xff] %vm222_vm3, %v466_v46  ;;  %v454_v53 = vmul.f32 %v689_v48, %v415_v47 }
 0x1f0   :  { %v691_v50 = vpop.eup %690 }
 0x1f1   :  { %v467_v51 = vmul.f32 %v454_v53, %v877_v61  ;;  %v416_v52 = vmul.f32 %v691_v50, %v383_v31 }
 0x1f2   :  { %v693_v54 = vpop.eup %692 }
 0x1f3   :  { %480 = vst.msk [vmem:[%s969_s4 + $0x50] sm:$0xff] %vm222_vm3, %v467_v51  ;;  %v455_v25 = vmul.f32 %v693_v54, %v416_v52 }
 0x1f4   :  { %v695_v57 = vpop.eup %694 }
 0x1f5   :  { %v468_v55 = vmul.f32 %v455_v25, %v885_v2  ;;  %v417_v56 = vmul.f32 %v695_v57, %v388_v40 }
 0x1f6   :  { %v697_v58 = vpop.eup %696 }
 0x1f7   :  { %481 = vst.msk [vmem:[%s969_s4 + $0x58] sm:$0xff] %vm222_vm3, %v468_v55  ;;  %v456_v59 = vmul.f32 %v697_v58, %v417_v56 }
 0x1f9   :  { %v469_v61 = vmul.f32 %v456_v59, %v893_v6 }
 0x1fb   :  { %483 = vst.msk [vmem:[%s969_s4 + $0x60] sm:$0x3] %vm482_vm4, %v469_v61 }

</bundles_post_ra>
